<compile_context>
chip_gen: v7x
topology: tpu7x:2x2x1
jax: 0.10.0
libtpu: 0.0.40
codegen_flags: <defaults>
</compile_context>

<pallas_src>
import functools

import jax
import jax.numpy as jnp
from jax.experimental import pallas as pl
from jax.experimental.pallas import tpu as pltpu


def _fpnconv_kernel(x_ref, top_ref, bot_ref, band_ref, affine_ref, o_ref):
    # x_ref:      (1, tile_h//8, 8, W*Cin)  centre rows of this tile
    # top_ref:    (1, 1, 8, W*Cin)          8-row group just above (clamped)
    # bot_ref:    (1, 1, 8, W*Cin)          8-row group just below (clamped)
    # band_ref:   (3*W*Cin, W*Cout)         ky-stacked banded conv weights
    # affine_ref: (2, W*Cout)               row0 = BN scale, row1 = BN shift
    # o_ref:      (1, tile_h, W*Cout)
    _, tile_h, _ = o_ref.shape
    wcin = x_ref.shape[-1]

    t = pl.program_id(1)
    is_first = t == 0
    is_last = t == pl.num_programs(1) - 1

    x_mid = x_ref[0].reshape(tile_h, wcin)          # rows [t*TH, (t+1)*TH)

    # Halo rows, zero-masked at the image top / bottom boundary.
    top_row = top_ref[0, 0, 7:8, :]
    bot_row = bot_ref[0, 0, 0:1, :]
    top_row = jnp.where(is_first, jnp.zeros_like(top_row), top_row)
    bot_row = jnp.where(is_last, jnp.zeros_like(bot_row), bot_row)

    # Shifted-row slabs via XLU sublane roll + a single masked halo-row insert
    # (replaces two full-slab concatenate copies along the row axis).
    rows = jax.lax.broadcasted_iota(jnp.int32, (tile_h, 1), 0)
    row_m1 = jnp.where(rows == 0, top_row, pltpu.roll(x_mid, 1, axis=0))
    row_p1 = jnp.where(rows == tile_h - 1, bot_row,
                       pltpu.roll(x_mid, tile_h - 1, axis=0))

    # One fused MXU matmul (K = 3*W*Cin) instead of three K = W*Cin matmuls:
    # one weight push / result pop per grid step; f32 accumulation.
    lhs = jnp.concatenate([row_m1, x_mid, row_p1], axis=1)
    acc = jnp.dot(lhs, band_ref[...], preferred_element_type=jnp.float32)

    # Folded BN (eval) + conv bias, then ELU(alpha=1), all in f32.  Clamp
    # before exp so the unselected branch cannot overflow.
    # TODO(synk): exp(min(y,0))-1 instead of expm1 (guaranteed Mosaic lowering);
    #             tiny precision loss only for y -> 0^-.
    y = acc * affine_ref[0:1, :] + affine_ref[1:2, :]
    y = jnp.where(y > 0, y, jnp.exp(jnp.minimum(y, 0.0)) - 1.0)
    o_ref[0] = y.astype(o_ref.dtype)


def fpnconv_prepare_params(w_oihw, conv_bias, bn_gamma, bn_beta, bn_mean,
                           bn_var, *, W, eps=1e-5, compute_dtype=jnp.float32):
    """Weight-only preprocessing, hoisted out of the per-call path.

    Returns:
      band:   (3*W*Cin, W*Cout) ky-stacked banded conv weights (compute_dtype)
      affine: (2, W*Cout) float32 — row 0 = folded BN scale, row 1 = shift.
    """
    Cout, Cin, kh, kw = w_oihw.shape
    assert (kh, kw) == (3, 3), "fpnconv uses a 3x3 kernel"
    wcin, wcout = W * Cin, W * Cout

    # band[ky, w_in*Cin+ci, w*Cout+co] = w[co, ci, ky, w_in - w + 1] when the
    # kx tap is in range, else 0 — out-of-range w_in implements the W padding.
    w_hwio = jnp.transpose(w_oihw, (2, 3, 1, 0)).astype(jnp.float32)  # (3,3,Ci,Co)
    k_in = jnp.arange(wcin)
    k_out = jnp.arange(wcout)
    wi, ci = k_in // Cin, k_in % Cin
    wo, co = k_out // Cout, k_out % Cout
    kx = wi[:, None] - wo[None, :] + 1                      # (W*Cin, W*Cout)
    valid = (kx >= 0) & (kx <= 2)
    kx_c = jnp.clip(kx, 0, 2)
    band = w_hwio[jnp.arange(3)[:, None, None],
                  kx_c[None, :, :],
                  ci[None, :, None],
                  co[None, None, :]]                        # (3, W*Cin, W*Cout)
    band = jnp.where(valid[None, :, :], band, 0.0)
    band = band.reshape(3 * wcin, wcout).astype(compute_dtype)

    # TODO(synk): per-W-tile band for large W (band is O(W^2*Cin*Cout)).
    assert band.size * jnp.dtype(compute_dtype).itemsize <= (24 << 20), (
        "band matrix too large for resident VMEM; tile W before using this "
        "kernel on large-W FPN levels")

    # BN (eval) + conv bias folded into per-channel scale/shift, tiled over W
    # so it lines up with the (w*Cout + co) lane layout.
    inv_std = 1.0 / jnp.sqrt(bn_var + eps)
    scale = bn_gamma * inv_std                              # (Cout,)
    shift = bn_beta + (conv_bias - bn_mean) * scale         # (Cout,)
    affine = jnp.stack([jnp.tile(scale, W), jnp.tile(shift, W)],
                       axis=0).astype(jnp.float32)          # (2, W*Cout)
    return band, affine


def fpnconv_forward_nhwc(x_nhwc, band, affine, *, tile_h=128):
    """(N, H, W, Cin) -> (N, H, W, Cout) float32.  NHWC fast path (no HBM
    transpose passes); use this entry point when the model is NHWC."""
    N, H, W, Cin = x_nhwc.shape
    wcin = W * Cin
    wcout = affine.shape[-1]
    Cout = wcout // W
    assert band.shape == (3 * wcin, wcout)
    assert H % 8 == 0, "demo kernel requires H to be a multiple of 8"
    assert tile_h >= 8

    # Largest row tile that is a multiple of 8 and divides H, capped at tile_h.
    th = min(tile_h, H) - (min(tile_h, H) % 8)
    while th > 8 and H % th != 0:
        th -= 8
    assert th >= 8 and th % 8 == 0 and H % th == 0
    # v7x: two TensorCores share the parallel grid axes — keep >= ~4 steps.
    while (N * (H // th) < 4 and th > 8 and (th // 2) % 8 == 0
           and H % (th // 2) == 0):
        th //= 2

    gpt = th // 8                 # 8-row groups per tile
    ng = H // 8                   # 8-row groups per image
    n_tiles = H // th

    x_g = x_nhwc.reshape(N, ng, 8, wcin).astype(band.dtype)

    # Explicit VMEM budget (double-buffered blocks + resident band); matters
    # most on v7x (64 MiB physical / 32 MiB scoped default).
    itemsize = jnp.dtype(band.dtype).itemsize
    in_blk = gpt * 8 * wcin * itemsize
    halo_blk = 2 * 8 * wcin * itemsize
    out_blk = th * wcout * 4
    band_bytes = band.size * itemsize
    vmem_est = 2 * (in_blk + halo_blk + out_blk + band_bytes) + 2 * (2 * wcout * 4)
    vmem_limit = int(min(max(2 * vmem_est, 32 << 20), 56 << 20))

    cost = pl.CostEstimate(
        flops=2 * N * H * W * Cout * 9 * Cin,
        transcendentals=N * H * W * Cout,
        bytes_accessed=(x_g.size * itemsize + band_bytes
                        + affine.size * 4 + N * H * wcout * 4))

    out2d = pl.pallas_call(
        _fpnconv_kernel,
        out_shape=jax.ShapeDtypeStruct((N, H, wcout), jnp.float32),
        grid_spec=pltpu.PrefetchScalarGridSpec(
            num_scalar_prefetch=0,
            grid=(N, n_tiles),
            in_specs=[
                # centre rows of this tile
                pl.BlockSpec((1, gpt, 8, wcin), lambda n, t: (n, t, 0, 0)),
                # 8-row group just above the tile (clamped; masked at t==0)
                pl.BlockSpec((1, 1, 8, wcin),
                             lambda n, t: (n, jnp.maximum(t * gpt - 1, 0), 0, 0)),
                # 8-row group just below the tile (clamped; masked at t==last)
                pl.BlockSpec((1, 1, 8, wcin),
                             lambda n, t: (n, jnp.minimum((t + 1) * gpt, ng - 1), 0, 0)),
                # ky-stacked band weights (constant index -> stays resident)
                pl.BlockSpec((3 * wcin, wcout), lambda n, t: (0, 0)),
                # fused BN scale / shift
                pl.BlockSpec((2, wcout), lambda n, t: (0, 0)),
            ],
            out_specs=pl.BlockSpec((1, th, wcout), lambda n, t: (n, t, 0)),
        ),
        compiler_params=pltpu.CompilerParams(
            dimension_semantics=("parallel", "parallel"),
            vmem_limit_bytes=vmem_limit),
        cost_estimate=cost,
    )(x_g, x_g, x_g, band, affine)

    return out2d.reshape(N, H, W, Cout)                     # free reshape


@functools.partial(jax.jit, static_argnames=("tile_h",))
def fpnconv_forward(x_nchw, band, affine, *, tile_h=128):
    """PyTorch-facing NCHW wrapper: (N, Cin, H, W) -> (N, Cout, H, W)."""
    # TODO(synk): keep the model NHWC end-to-end and call fpnconv_forward_nhwc
    #             directly to drop these two full read+write HBM passes.
    x_nhwc = jnp.transpose(x_nchw, (0, 2, 3, 1))
    out_nhwc = fpnconv_forward_nhwc(x_nhwc, band, affine, tile_h=tile_h)
    return jnp.transpose(out_nhwc, (0, 3, 1, 2))


def _reference(x_nchw, w_oihw, conv_bias, bn_gamma, bn_beta, bn_mean, bn_var,
               eps=1e-5):
    y = jax.lax.conv_general_dilated(
        x_nchw, w_oihw, window_strides=(1, 1), padding=((1, 1), (1, 1)),
        dimension_numbers=("NCHW", "OIHW", "NCHW"))
    y = y + conv_bias[None, :, None, None]
    y = (y - bn_mean[None, :, None, None]) / jnp.sqrt(
        bn_var[None, :, None, None] + eps)
    y = y * bn_gamma[None, :, None, None] + bn_beta[None, :, None, None]
    return jnp.where(y > 0, y, jnp.exp(jnp.minimum(y, 0.0)) - 1.0)


if __name__ == "__main__":
    key = jax.random.PRNGKey(0)
    k_x, k_w, k_b, k_g, k_be, k_m, k_v = jax.random.split(key, 7)

    N, Cin, Cout, H, W = 2, 4, 8, 16, 16

    x = jax.random.normal(k_x, (N, Cin, H, W), dtype=jnp.float32)
    w = jax.random.normal(k_w, (Cout, Cin, 3, 3), dtype=jnp.float32) * 0.1
    conv_bias = 0.1 * jax.random.normal(k_b, (Cout,), dtype=jnp.float32)
    bn_gamma = 1.0 + 0.1 * jax.random.normal(k_g, (Cout,), dtype=jnp.float32)
    bn_beta = 0.1 * jax.random.normal(k_be, (Cout,), dtype=jnp.float32)
    bn_mean = 0.1 * jax.random.normal(k_m, (Cout,), dtype=jnp.float32)
    bn_var = jnp.abs(jax.random.normal(k_v, (Cout,), dtype=jnp.float32)) + 0.5

    ref = _reference(x, w, conv_bias, bn_gamma, bn_beta, bn_mean, bn_var)

    # Path 1: f32 compute, explicit small tile (exercises both halo branches).
    band32, affine32 = fpnconv_prepare_params(
        w, conv_bias, bn_gamma, bn_beta, bn_mean, bn_var, W=W,
        compute_dtype=jnp.float32)
    out32 = jax.block_until_ready(fpnconv_forward(x, band32, affine32, tile_h=8))
    assert out32.shape == (N, Cout, H, W)
    assert jnp.allclose(out32, ref, atol=1e-4, rtol=1e-4)

    # Path 2: bf16 activations + band (v6e/v7x recommended), default tile_h
    # (auto-clamped / auto-split by the wrapper); looser tolerance for bf16.
    band16, affine16 = fpnconv_prepare_params(
        w, conv_bias, bn_gamma, bn_beta, bn_mean, bn_var, W=W,
        compute_dtype=jnp.bfloat16)
    out16 = jax.block_until_ready(fpnconv_forward(x, band16, affine16))
    assert out16.shape == (N, Cout, H, W)
    assert jnp.allclose(out16, ref, atol=6e-2, rtol=6e-2)

    print("KERNEL_OK")
</pallas_src>

<mosaic_0001>
module attributes {stable_mosaic.version = 11 : i64} {
  func.func @_fpnconv_kernel(%arg0: i32, %arg1: i32, %arg2: memref<1x1x8x64xf32, #tpu.memory_space<vmem>>, %arg3: memref<1x1x8x64xf32, #tpu.memory_space<vmem>>, %arg4: memref<1x1x8x64xf32, #tpu.memory_space<vmem>>, %arg5: memref<192x128xf32, #tpu.memory_space<vmem>>, %arg6: memref<2x128xf32, #tpu.memory_space<vmem>>, %arg7: memref<1x8x128xf32, #tpu.memory_space<vmem>>) attributes {dimension_semantics = [#tpu.dimension_semantics<parallel>, #tpu.dimension_semantics<parallel>], iteration_bounds = array<i64: 2, 2>, scalar_prefetch = 0 : i64, scratch_operands = 0 : i64, tpu.core_type = #tpu.core_type<tc>, window_params = [{transform_indices = @transform_0, window_bounds = array<i64: 1, 1, 8, 64>}, {transform_indices = @transform_1, window_bounds = array<i64: 1, 1, 8, 64>}, {transform_indices = @transform_2, window_bounds = array<i64: 1, 1, 8, 64>}, {pipeline_mode = #tpu.pipeline_mode<synchronous>, transform_indices = @transform_3, window_bounds = array<i64: 192, 128>}, {pipeline_mode = #tpu.pipeline_mode<synchronous>, transform_indices = @transform_4, window_bounds = array<i64: 2, 128>}, {transform_indices = @transform_5, window_bounds = array<i64: 1, 8, 128>}]} {
    %c0_i32 = arith.constant 0 : i32
    %0 = arith.cmpi eq, %arg1, %c0_i32 : i32
    %c1_i32 = arith.constant 1 : i32
    %1 = arith.cmpi eq, %arg1, %c1_i32 : i32
    %c0 = arith.constant 0 : index
    %c0_0 = arith.constant 0 : index
    %c0_1 = arith.constant 0 : index
    %c0_2 = arith.constant 0 : index
    %2 = vector.load %arg2[%c0, %c0_0, %c0_1, %c0_2] : memref<1x1x8x64xf32, #tpu.memory_space<vmem>>, vector<1x1x8x64xf32>
    %3 = vector.shape_cast %2 : vector<1x1x8x64xf32> to vector<1x8x64xf32>
    %4 = vector.shape_cast %3 : vector<1x8x64xf32> to vector<8x64xf32>
    %c0_3 = arith.constant 0 : index
    %c0_4 = arith.constant 0 : index
    %c7 = arith.constant 7 : index
    %c0_5 = arith.constant 0 : index
    %5 = vector.load %arg3[%c0_3, %c0_4, %c7, %c0_5] : memref<1x1x8x64xf32, #tpu.memory_space<vmem>>, vector<1x1x1x64xf32>
    %6 = vector.shape_cast %5 : vector<1x1x1x64xf32> to vector<1x64xf32>
    %c0_6 = arith.constant 0 : index
    %c0_7 = arith.constant 0 : index
    %c0_8 = arith.constant 0 : index
    %c0_9 = arith.constant 0 : index
    %7 = vector.load %arg4[%c0_6, %c0_7, %c0_8, %c0_9] : memref<1x1x8x64xf32, #tpu.memory_space<vmem>>, vector<1x1x1x64xf32>
    %8 = vector.shape_cast %7 : vector<1x1x1x64xf32> to vector<1x64xf32>
    %cst = arith.constant 0.000000e+00 : f32
    %9 = vector.broadcast %cst : f32 to vector<1x64xf32>
    %10 = arith.select %0, %9, %6 : vector<1x64xf32>
    %cst_10 = arith.constant 0.000000e+00 : f32
    %11 = vector.broadcast %cst_10 : f32 to vector<1x64xf32>
    %12 = arith.select %1, %11, %8 : vector<1x64xf32>
    %13 = tpu.iota {dimensions = array<i32: 0>} : vector<8x1xi32>
    %c0_i32_11 = arith.constant 0 : i32
    %14 = vector.broadcast %c0_i32_11 : i32 to vector<8x1xi32>
    %15 = arith.cmpi eq, %13, %14 : vector<8x1xi32>
    %c1_i32_12 = arith.constant 1 : i32
    %16 = tpu.dynamic_rotate %4 by %c1_i32_12 dim 0 : vector<8x64xf32>, i32 -> vector<8x64xf32>
    %17 = vector.shape_cast %15 : vector<8x1xi1> to vector<8x1xi1>
    %18 = vector.broadcast %17 : vector<8x1xi1> to vector<8x64xi1>
    %19 = vector.shape_cast %10 : vector<1x64xf32> to vector<1x64xf32>
    %20 = vector.broadcast %19 : vector<1x64xf32> to vector<8x64xf32>
    %21 = arith.select %18, %20, %16 : vector<8x64xi1>, vector<8x64xf32>
    %c7_i32 = arith.constant 7 : i32
    %22 = vector.broadcast %c7_i32 : i32 to vector<8x1xi32>
    %23 = arith.cmpi eq, %13, %22 : vector<8x1xi32>
    %c7_i32_13 = arith.constant 7 : i32
    %24 = tpu.dynamic_rotate %4 by %c7_i32_13 dim 0 : vector<8x64xf32>, i32 -> vector<8x64xf32>
    %25 = vector.shape_cast %23 : vector<8x1xi1> to vector<8x1xi1>
    %26 = vector.broadcast %25 : vector<8x1xi1> to vector<8x64xi1>
    %27 = vector.shape_cast %12 : vector<1x64xf32> to vector<1x64xf32>
    %28 = vector.broadcast %27 : vector<1x64xf32> to vector<8x64xf32>
    %29 = arith.select %26, %28, %24 : vector<8x64xi1>, vector<8x64xf32>
    %30 = tpu.concatenate %21, %4, %29 in 1 : vector<8x64xf32>, vector<8x64xf32>, vector<8x64xf32> -> vector<8x192xf32>
    %c0_14 = arith.constant 0 : index
    %c0_15 = arith.constant 0 : index
    %31 = vector.load %arg5[%c0_14, %c0_15] : memref<192x128xf32, #tpu.memory_space<vmem>>, vector<192x128xf32>
    %cst_16 = arith.constant dense<0.000000e+00> : vector<8x128xf32>
    %32 = tpu.matmul %30, %31, %cst_16 {dimension_numbers = #tpu.dot_dimension_numbers<[1], [0], [0], [1], [0, 0, 1, 1], [], []>} : vector<8x192xf32>, vector<192x128xf32>, vector<8x128xf32> -> vector<8x128xf32>
    %c0_17 = arith.constant 0 : index
    %c0_18 = arith.constant 0 : index
    %33 = vector.load %arg6[%c0_17, %c0_18] : memref<2x128xf32, #tpu.memory_space<vmem>>, vector<1x128xf32>
    %34 = vector.broadcast %33 : vector<1x128xf32> to vector<8x128xf32>
    %35 = arith.mulf %32, %34 : vector<8x128xf32>
    %c1 = arith.constant 1 : index
    %c0_19 = arith.constant 0 : index
    %36 = vector.load %arg6[%c1, %c0_19] : memref<2x128xf32, #tpu.memory_space<vmem>>, vector<1x128xf32>
    %37 = vector.broadcast %36 : vector<1x128xf32> to vector<8x128xf32>
    %38 = arith.addf %35, %37 : vector<8x128xf32>
    %cst_20 = arith.constant 0.000000e+00 : f32
    %39 = vector.broadcast %cst_20 : f32 to vector<8x128xf32>
    %40 = arith.cmpf ogt, %38, %39 : vector<8x128xf32>
    %cst_21 = arith.constant 0.000000e+00 : f32
    %41 = vector.broadcast %cst_21 : f32 to vector<8x128xf32>
    %42 = arith.minimumf %38, %41 : vector<8x128xf32>
    %43 = math.exp %42 : vector<8x128xf32>
    %cst_22 = arith.constant 1.000000e+00 : f32
    %44 = vector.broadcast %cst_22 : f32 to vector<8x128xf32>
    %45 = arith.subf %43, %44 : vector<8x128xf32>
    %46 = arith.select %40, %38, %45 : vector<8x128xi1>, vector<8x128xf32>
    %c0_23 = arith.constant 0 : index
    %c0_24 = arith.constant 0 : index
    %c0_25 = arith.constant 0 : index
    %47 = vector.load %arg7[%c0_23, %c0_24, %c0_25] : memref<1x8x128xf32, #tpu.memory_space<vmem>>, vector<1x8x128xf32>
    %48 = vector.shape_cast %47 : vector<1x8x128xf32> to vector<8x128xf32>
    %49 = vector.shape_cast %46 : vector<8x128xf32> to vector<1x8x128xf32>
    tpu.vector_store %arg7[%c0_23, %c0_24, %c0_25], %49 {strides = array<i32>} : memref<1x8x128xf32, #tpu.memory_space<vmem>>, vector<1x8x128xf32>,
    return
  }
  func.func @transform_0(%arg0: i32, %arg1: i32) -> (i32, i32, i32, i32) {
    %c0_i32 = arith.constant 0 : i32
    %c0_i32_0 = arith.constant 0 : i32
    %c0_i32_1 = arith.constant 0 : i32
    return %arg0, %arg1, %c0_i32, %c0_i32_0 : i32, i32, i32, i32
  }
  func.func @transform_1(%arg0: i32, %arg1: i32) -> (i32, i32, i32, i32) {
    %c1_i32 = arith.constant 1 : i32
    %0 = arith.muli %arg1, %c1_i32 : i32
    %c1_i32_0 = arith.constant 1 : i32
    %1 = arith.subi %0, %c1_i32_0 : i32
    %c0_i32 = arith.constant 0 : i32
    %2 = arith.maxsi %1, %c0_i32 : i32
    %c0_i32_1 = arith.constant 0 : i32
    %c0_i32_2 = arith.constant 0 : i32
    %c0_i32_3 = arith.constant 0 : i32
    return %arg0, %2, %c0_i32_1, %c0_i32_2 : i32, i32, i32, i32
  }
  func.func @transform_2(%arg0: i32, %arg1: i32) -> (i32, i32, i32, i32) {
    %c1_i32 = arith.constant 1 : i32
    %0 = arith.addi %arg1, %c1_i32 : i32
    %c1_i32_0 = arith.constant 1 : i32
    %1 = arith.muli %0, %c1_i32_0 : i32
    %c1_i32_1 = arith.constant 1 : i32
    %2 = arith.minsi %1, %c1_i32_1 : i32
    %c0_i32 = arith.constant 0 : i32
    %c0_i32_2 = arith.constant 0 : i32
    %c0_i32_3 = arith.constant 0 : i32
    return %arg0, %2, %c0_i32, %c0_i32_2 : i32, i32, i32, i32
  }
  func.func @transform_3(%arg0: i32, %arg1: i32) -> (i32, i32) {
    %c0_i32 = arith.constant 0 : i32
    %c0_i32_0 = arith.constant 0 : i32
    %c0_i32_1 = arith.constant 0 : i32
    return %c0_i32, %c0_i32_0 : i32, i32
  }
  func.func @transform_4(%arg0: i32, %arg1: i32) -> (i32, i32) {
    %c0_i32 = arith.constant 0 : i32
    %c0_i32_0 = arith.constant 0 : i32
    %c0_i32_1 = arith.constant 0 : i32
    return %c0_i32, %c0_i32_0 : i32, i32
  }
  func.func @transform_5(%arg0: i32, %arg1: i32) -> (i32, i32, i32) {
    %c0_i32 = arith.constant 0 : i32
    %c0_i32_0 = arith.constant 0 : i32
    return %arg0, %arg1, %c0_i32 : i32, i32, i32
  }
}

</mosaic_0001>

<bundles_post_ra>
// kernel: fpnconv_forward.1
= control target key start
LH: loop header
LB: loop body
LE: loop exit
PB: predicated region body
PF: predicated region fallthrough
CT: control target
= control target key end

     0   :  { %s821_s18 = smov 0   ;;  %s823_s19 = smov 0   ;;  %s1009_s0 = inlined_call_operand.vmem [shape: f32[2,2,8,64], index: 0, kind: input, shape index: {}, may-alias: {0,1,2}]   ;;  %s1010_s1 = inlined_call_operand.vmem [shape: f32[2,2,8,64], index: 1, kind: input, shape index: {}, may-alias: {0,1,2}]   ;;  %s1011_s2 = inlined_call_operand.vmem [shape: f32[2,2,8,64], index: 2, kind: input, shape index: {}, may-alias: {0,1,2}]   ;;  %s1012_s3 = inlined_call_operand.vmem [shape: f32[192,128], index: 3, kind: input, shape index: {}]   ;;  %s1013_s4 = inlined_call_operand.vmem [shape: f32[2,128], index: 4, kind: input, shape index: {}]   ;;  %s1014_s5 = inlined_call_operand.vmem [shape: f32[2,16,128], index: 5, kind: output, shape index: {}]  }
   0x1   :  { %s825_s20 = smov 0   ;;  %s827_s21 = smov 0  }
   0x2   :  { %s829_s22 = smov 0  }
   0x3 LB: > { %s24_s23 = sadd.s32 1, %s779_s20  ;;  %s27_s24 = sadd.s32 1, %s783_s21  ;;  %s787_s22 = sphi %s829_s22, %s15_s22   ;;  %s783_s21 = sphi %s827_s21, %s1019_s21   ;;  %s779_s20 = sphi %s825_s20, %s1018_s20   ;;  %s775_s19 = sphi %s823_s19, %s1017_s19   ;;  %s771_s18 = sphi %s821_s18, %s1016_s18  }
   0x4   : > { %p25_p0 = scmp.ge.s32.totalorder %s24_s23, 2  ;;  %p643_p1 = scmp.ge.s32.totalorder %s787_s22, 1 }
   0x5   : > { %p260_p2 = scmp.lt.s32.totalorder %s787_s22, 5 }
   0x6   : > { %s1021_s23 = smov (%p25_p0, %s24_s23), 0  ;;  %s1023_s24 = smov (!%p25_p0, %s27_s24), %s783_s21 }
   0x7   : > { %p261_p3 = pnand %p643_p1, %p260_p2  ;;  %p29_p4 = scmp.ge.s32.totalorder %s1023_s24, 2 }
   0x8   : > { %p316_p5 = scmp.lt.s32.totalorder (!%p261_p3), %s775_s19, 1  ;;  %p318_p6 = scmp.lt.s32.totalorder (!%p261_p3), %s771_s18, 1  ;;  %v399_v0 = vld [vmem:[%s1012_s3] sm:$0xff] (!%p261_p3)  ;;  %v400_v1 = vld [vmem:[%s1012_s3 + $0x8] sm:$0xff] (!%p261_p3)  ;;  %v401_v2 = vld [vmem:[%s1012_s3 + $0x10] sm:$0xff] (!%p261_p3)  ;;  %v789_v3 = vmov (!%p261_p3), 0.0|0.0   ;;  %v373_v13 = vlaneseq (!%p261_p3) }
   0x9   : > { %s1025_s24 = smov (%p29_p4, %s1023_s24), 0  ;;  %264 = sbr.rel (%p261_p3) target bundleno = 374 (0x176), region = 40 }
   0xa   : > { %s864_s6 = sadd.s32 (!%p261_p3), 4294967295, %s771_s18  ;;  %669 = vmatprep.subr.bf16.mxu0 (!%p261_p3), %v789_v3  ;;  %v670_v4 = vpack.c.bf16 (!%p261_p3), %v400_v1, %v399_v0  ;;  %v402_v5 = vld [vmem:[%s1012_s3 + $0x18] sm:$0xff] (!%p261_p3)  ;;  %v403_v7 = vld [vmem:[%s1012_s3 + $0x20] sm:$0xff] (!%p261_p3)  ;;  %v404_v8 = vld [vmem:[%s1012_s3 + $0x28] sm:$0xff] (!%p261_p3)  ;;  %s338_s17 = sadd.s32 (!%p261_p3), 1, %s771_s18  ;;  %v374_v17 = vshrl.u32 (!%p261_p3), %v373_v13, 7 }
   0xb   : > { %v673_v6 = vpack.c.bf16 (!%p261_p3), %v402_v5, %v401_v2  ;;  %p325_p7 = scmp.gt.s32.totalorder (!%p261_p3), %s864_s6, 0  ;;  %p647_p8 = scmp.lt.s32.totalorder (!%p261_p3), %s864_s6, 1  ;;  %v676_v9 = vpack.c.bf16 (!%p261_p3), %v404_v8, %v403_v7  ;;  %v405_v11 = vld [vmem:[%s1012_s3 + $0x30] sm:$0xff] (!%p261_p3)  ;;  %v406_v12 = vld [vmem:[%s1012_s3 + $0x38] sm:$0xff] (!%p261_p3)  ;;  %v407_v15 = vld [vmem:[%s1012_s3 + $0x40] sm:$0xff] (!%p261_p3)  ;;  %vm397_vm2 = vcmask (!%p261_p3), 523264  }
   0xc   : > { %671 = vmatpush1.bf16.msra.mxu0 (!%p261_p3), %v670_v4  ;;  %s790_s8 = smov (!%p261_p3), 64   ;;  %p901_p9 = scmp.lt.s32.totalorder (!%p261_p3), %s338_s17, 1  ;;  %v679_v14 = vpack.c.bf16 (!%p261_p3), %v406_v12, %v405_v11  ;;  %v408_v16 = vld [vmem:[%s1012_s3 + $0x48] sm:$0xff] (!%p261_p3)  ;;  %v409_v19 = vld [vmem:[%s1012_s3 + $0x50] sm:$0xff] (!%p261_p3)  ;;  %v410_v20 = vld [vmem:[%s1012_s3 + $0x58] sm:$0xff] (!%p261_p3)  ;;  %v381_v22 = vsub.s32 (!%p261_p3), 0, %v374_v17 }
   0xd   : > { %672 = vmatprep.subr.bf16.mxu0 (!%p261_p3), %v789_v3  ;;  %p361_p10 = scmp.eq.s32.totalorder (!%p261_p3), %s771_s18, 1  ;;  %p360_p11 = scmp.eq.s32.totalorder (!%p261_p3), %s771_s18, 0  ;;  %v682_v18 = vpack.c.bf16 (!%p261_p3), %v408_v16, %v407_v15  ;;  %v685_v23 = vpack.c.bf16 (!%p261_p3), %v410_v20, %v409_v19  ;;  %v411_v24 = vld [vmem:[%s1012_s3 + $0x60] sm:$0xff] (!%p261_p3)  ;;  %v412_v26 = vld [vmem:[%s1012_s3 + $0x68] sm:$0xff] (!%p261_p3)  ;;  %vm384_vm1 = vcmp.eq.s32.totalorder (!%p261_p3), %v374_v17, 7  ;;  %v413_v34 = vld [vmem:[%s1012_s3 + $0x70] sm:$0xff] (!%p261_p3) }
   0xe   : > { %v688_v33 = vpack.c.bf16 (!%p261_p3), %v412_v26, %v411_v24  ;;  %v414_v35 = vld [vmem:[%s1012_s3 + $0x78] sm:$0xff] (!%p261_p3)  ;;  %vm375_vm4 = vcmp.eq.s32.totalorder (!%p261_p3), %v374_v17, 0  ;;  %v415_v41 = vld [vmem:[%s1012_s3 + $0x80] sm:$0xff] (!%p261_p3)  ;;  %v416_v42 = vld [vmem:[%s1012_s3 + $0x88] sm:$0xff] (!%p261_p3) }
   0xf   : > { %v691_v39 = vpack.c.bf16 (!%p261_p3), %v414_v35, %v413_v34  ;;  %v694_v43 = vpack.c.bf16 (!%p261_p3), %v416_v42, %v415_v41  ;;  %v417_v44 = vld [vmem:[%s1012_s3 + $0x90] sm:$0xff] (!%p261_p3)  ;;  %v418_v45 = vld [vmem:[%s1012_s3 + $0x98] sm:$0xff] (!%p261_p3)  ;;  %v419_v47 = vld [vmem:[%s1012_s3 + $0xa0] sm:$0xff] (!%p261_p3) }
  0x10   : > { %s1027_s19 = smov (!%p316_p5, %s775_s19), 1  ;;  %674 = vmatpush1.bf16.msra.mxu0 %v673_v6  ;;  %s1031_s17 = smov (!%p901_p9, %s338_s17), 1  ;;  %v697_v46 = vpack.c.bf16 %v418_v45, %v417_v44  ;;  %v420_v48 = vld [vmem:[%s1012_s3 + $0xa8] sm:$0xff]  ;;  %v421_v50 = vld [vmem:[%s1012_s3 + $0xb0] sm:$0xff]  ;;  %v422_v51 = vld [vmem:[%s1012_s3 + $0xb8] sm:$0xff] }
  0x11   : > { %s319_s9 = scalar_select %p318_p6, %s771_s18, 1  ;;  %675 = vmatprep.subr.bf16.mxu0 %v789_v3  ;;  %v700_v49 = vpack.c.bf16 %v420_v48, %v419_v47  ;;  %v703_v52 = vpack.c.bf16 %v422_v51, %v421_v50  ;;  %v662_v55 = vld [vmem:[%s1013_s4] ss:$0 sm:$0xff]  ;;  %v663_v57 = vld [vmem:[%s1013_s4 + $0x1] ss:$0 sm:$0xff] }
  0x12   : > { %s871_s10 = sshll.u32 %s1027_s19, 1  ;;  %s1033_s17 = smov (!%p901_p9, %s1031_s17), 1 }
  0x13   : > { %s321_s15 = sadd.s32 %s871_s10, %s319_s9  ;;  %s346_s29 = sadd.s32 %s871_s10, %s1033_s17 }
  0x14   : > { %s883_s16 = sshll.u32 %s321_s15, 3  ;;  %677 = vmatpush1.bf16.msra.mxu0 %v676_v9 }
  0x15   : > { %s323_s26 = scalar_lea.vmem %s1009_s0, %s883_s16  ;;  %678 = vmatprep.subr.bf16.mxu0 %v789_v3  ;;  %s359_s30 = scalar_lea.vmem %s1014_s5, %s883_s16 }
  0x16   : > { %s326_s27 = scalar_select %p325_p7, %s864_s6, 0  ;;  %v891_v10 = vld [vmem:[%s323_s26] sm:$0xff] }
  0x17   : > { %394 = vrot.lane.b32.xlu0 %v891_v10, %s790_s8  ;;  %s369_s28 = scalar_select %p361_p10, 1, 0  ;;  %v385_v25 = vrot.slane %v891_v10, 1  ;;  %v376_v32 = vrot.slane %v891_v10, 7 }
  0x18   : > { %s1029_s27 = smov (!%p647_p8, %s326_s27), 1  ;;  %680 = vmatpush1.bf16.msra.mxu0 %v679_v14 }
  0x19   : > { %s332_s11 = sadd.s32 %s1029_s27, %s871_s10  ;;  %681 = vmatprep.subr.bf16.mxu0 %v789_v3  ;;  %v370_v21 = vstv %s369_s28 }
  0x1a   : > { %s653_s6 = sshll.u32 %s332_s11, 3  ;;  %s658_s11 = sshll.u32 %s346_s29, 3  ;;  %vm371_vm0 = vcmp.eq.s32.totalorder %v370_v21, 1 }
  0x1b   : > { %s334_s8 = scalar_lea.vmem %s1010_s1, %s653_s6  ;;  %s348_s15 = scalar_lea.vmem %s1011_s2, %s658_s11 }
  0x1c   : > { %683 = vmatpush1.bf16.msra.mxu0 %v682_v18  ;;  %v364_v27 = vld [vmem:[%s348_s15] sm:$0x1]  ;;  %s365_s6 = scalar_select %p360_p11, 1, 0  ;;  %v363_v28 = vld [vmem:[%s334_s8 + $0x7] sm:$0x1] }
  0x1d   : > { %684 = vmatprep.subr.bf16.mxu0 %v789_v3  ;;  %v372_v29 = vsel %vm371_vm0, 0.0, %v364_v27 }
  0x1e   : > { %v391_v30 = vrot.slane %v372_v29, %v381_v22  ;;  %v366_v31 = vstv %s365_s6 }
  0x1f   : > { %vm367_vm3 = vcmp.eq.s32.totalorder %v366_v31, 1 }
  0x20   : > { %686 = vmatpush1.bf16.msra.mxu0 %v685_v23  ;;  %v392_v36 = vsel %vm384_vm1, %v391_v30, %v385_v25  ;;  %v368_v37 = vsel %vm367_vm3, 0.0, %v363_v28 }
  0x21   : > { %687 = vmatprep.subr.bf16.mxu0 %v789_v3  ;;  %661 = vmatprep.mubr.msk.f32.mxu0 %vm397_vm2, %v392_v36  ;;  %v382_v38 = vrot.slane %v368_v37, %v381_v22 }
  0x23   : > { %v383_v40 = vsel %vm375_vm4, %v382_v38, %v376_v32 }
  0x24   : > { %689 = vmatpush1.bf16.msra.mxu0 %v688_v33 }
  0x25   : > { %690 = vmatprep.subr.bf16.mxu0 %v789_v3 }
  0x28   : > { %692 = vmatpush1.bf16.msra.mxu0 %v691_v39 }
  0x29   : > { %693 = vmatprep.subr.bf16.mxu0 %v789_v3 }
  0x2c   : > { %695 = vmatpush1.bf16.msra.mxu0 %v694_v43 }
  0x2d   : > { %696 = vmatprep.subr.bf16.mxu0 %v789_v3 }
  0x30   : > { %698 = vmatpush1.bf16.msra.mxu0 %v697_v46 }
  0x31   : > { %699 = vmatprep.subr.bf16.mxu0 %v789_v3 }
  0x34   : > { %701 = vmatpush1.bf16.msra.mxu0 %v700_v49 }
  0x35   : > { %702 = vmatprep.subr.bf16.mxu0 %v789_v3 }
  0x38   : > { %704 = vmatpush1.bf16.msra.mxu0 %v703_v52 }
  0x89   : > { %v395_v53 = vpop.permute.xlu0 %394 }
  0x8a   : > { %v398_v54 = vsel %vm397_vm2, %v383_v40, %v395_v53 }
  0x8b   : > { %491 = vmatmul.mubr.f32.vlgmr.msra.gmra.mrb[0].mxu0 %v398_v54 }
 0x15e   : > { %v492_v56 = vpop.f32.mrb[0].mxu0 }
 0x15f   : > { %v501_v58 = vmul.f32 %v662_v55, %v492_v56  ;;  %v494_v59 = vpop.f32.mrb[1].mxu0 }
 0x161   : > { %v507_v60 = vadd.f32 %v663_v57, %v501_v58 }
 0x163   : > { %v509_v61 = vmin.f32 %v507_v60, 0.0  ;;  %vm508_vm5 = vcmp.gt.f32.partialorder %v507_v60, 0.0 }
 0x165   : > { %v510_v62 = vmul.f32 1.442695, %v509_v61 }
 0x167   : > { %747 = vpow2.f32 %v510_v62 }
 0x171   : > { %v748_v63 = vpop.eup %747 }
 0x172   : > { %v664_v0 = vadd.f32 -1.0, %v748_v63 }
 0x174   : > { %v513_v1 = vsel %vm508_vm5, %v507_v60, %v664_v0 }
 0x175   : > { %514 = vst [vmem:[%s359_s30] sm:$0xff] %v513_v1 }
 0x176 PF: > { %s15_s22 = sadd.s32 1, %s787_s22   ;;  %s1016_s18 = smov %s779_s20 }
 0x177   : > { %p12_p12 = scmp.ge.s32.totalorder %s15_s22, 6   ;;  %s1017_s19 = smov %s783_s21 }
 0x178   : > { %s1018_s20 = smov %s1021_s23  ;;  %s1019_s21 = smov %s1025_s24 }
 0x179   :  { %14 = sbr.rel (!%p12_p12) target bundleno = 3 (0x3), region = 76 }

</bundles_post_ra>
